<compile_context>
chip_gen: v7x
topology: tpu7x:2x2x1
jax: 0.10.0
libtpu: 0.0.40
codegen_flags: <defaults>
</compile_context>

<pallas_src>
import jax
import jax.numpy as jnp
from jax.experimental import pallas as pl
from jax.experimental.pallas import tpu as pltpu


def _round_up(x: int, m: int) -> int:
    return ((x + m - 1) // m) * m


def _vmem_capacity_bytes() -> int:
    try:
        return int(pltpu.get_tpu_info().vmem_capacity_bytes)
    except Exception:  # conservative fallback (v7x-sized VMEM)
        return 64 * 1024 * 1024


def _pick_tm(batch: int, tm_cap: int, sub: int) -> int:
    """Batch-tile size: multiple of `sub`, <= tm_cap, masked-row waste of the
    ragged last tile under ~12.5%, and (when batch allows) >= 2 grid steps so
    the 'parallel' batch axis can shard across both TensorCores on v7x."""
    b_al = _round_up(batch, sub)
    cap = max(sub, min((tm_cap // sub) * sub, b_al))
    best = sub
    t = cap
    while t >= sub:
        g = -(-batch // t)                       # grid steps at tile t
        waste = (g * t - batch) / float(g * t)   # masked-row fraction
        if waste <= 0.125 and (g >= 2 or t >= b_al):
            best = t
            break
        t = ((t // 2) // sub) * sub
    while best > sub and -(-batch // best) < 2:  # force >=2 steps when possible
        best = max(sub, ((best // 2) // sub) * sub)
    return best


def _pad_cast(a, shape, dtype):
    """Zero-pad `a` up to `shape` and cast; skips the copy when it's a no-op."""
    if a.shape == shape:
        return a if a.dtype == dtype else a.astype(dtype)
    out = jnp.zeros(shape, dtype)
    return out.at[tuple(slice(0, s) for s in a.shape)].set(a.astype(dtype))


def mlp_kernel(x_ref, w1_ref, b1_ref, w2_ref, b2_ref, o_ref, acc_ref):
    """One (batch-tile, hidden-panel) grid step of ReLU(x@W1 + b1) @ W2 + b2."""
    k = pl.program_id(1)

    @pl.when(k == 0)
    def _init():
        acc_ref[...] = jnp.zeros_like(acc_ref)

    # Cast x to the MXU compute dtype on the VPU (avoids a wrapper HBM pass).
    x = x_ref[...].astype(w1_ref.dtype)
    h = jnp.dot(x, w1_ref[...], preferred_element_type=jnp.float32)
    h = jnp.maximum(h + b1_ref[...], 0.0)          # bias + ReLU in f32
    # Per-hidden-unit ReLU/bias make the H-panel split exact: panels just sum.
    acc_ref[...] += jnp.dot(h.astype(w2_ref.dtype), w2_ref[...],
                            preferred_element_type=jnp.float32)

    @pl.when(k == pl.num_programs(1) - 1)
    def _finalize():
        o_ref[...] = (acc_ref[...] + b2_ref[...]).astype(o_ref.dtype)


def red_neuronal_forward(x, w1, b1, w2, b2, *, block_batch=512,
                         compute_dtype=jnp.bfloat16):
    """Fused Linear -> ReLU -> Linear, matching RedNeuronal.forward.

    x: (B, I)  w1: (I, H)  b1: (H,)  w2: (H, O)  b2: (O,) -> (B, O) float32.
    """
    B, I = x.shape
    H = w1.shape[1]
    O = w2.shape[1]

    LANE = 128
    SUB = 16                                    # one bf16 vreg is [16, 128]
    itm = jnp.dtype(compute_dtype).itemsize

    O_p = _round_up(O, LANE)                    # lane-dense output store
    H_128 = _round_up(H, LANE)

    # Per-chip VMEM budget with ~15% headroom (v7x 64 MiB, v5e/v6e 128 MiB).
    vmem_cap = int(0.85 * _vmem_capacity_bytes())
    slack = 2 * 1024 * 1024

    # Hidden-panel size TH: keep resident weights under ~45% of the budget;
    # otherwise stream 128-multiple H panels over an inner "arbitrary" axis.
    TH = H_128
    if (I * TH + TH * O_p) * itm + (TH + O_p) * 4 > 0.45 * vmem_cap:
        per_col = 2 * ((I + O_p) * itm + 4)     # double-buffered streamed panels
        TH = max(LANE, (int(0.45 * vmem_cap) // per_col // LANE) * LANE)
    H_p = _round_up(H, TH)
    n_k = H_p // TH
    single_panel = n_k == 1
    w_bufs = 1 if single_panel else 2
    weight_bytes = w_bufs * ((I * TH + TH * O_p) * itm + TH * 4) + O_p * 4

    # Batch tile TM: budget against x/out tiles + the f32 hidden panel.
    per_row = (2 * I * 4                        # x tile (f32), double-buffered
               + I * itm                        # in-kernel compute-dtype copy of x
               + 2 * O_p * 4                    # out tile (f32), double-buffered
               + O_p * 4                        # f32 accumulator scratch
               + TH * 4 + TH * itm)             # hidden panel f32 + recast
    tm_budget = max(SUB, (vmem_cap - weight_bytes - slack) // per_row)
    TM = _pick_tm(B, min(block_batch, tm_budget), SUB)
    n_i = pl.cdiv(B, TM)

    # Pad H to a TH multiple and O to a lane multiple once (exact: padded W1
    # columns give ReLU(0)=0 hidden units; padded W2 rows / bias entries add 0).
    # x itself stays unpadded — no HBM blowup, no extra pre-pass.
    w1_p = _pad_cast(w1, (I, H_p), compute_dtype)
    w2_p = _pad_cast(w2, (H_p, O_p), compute_dtype)
    b1_p = _pad_cast(b1.reshape(1, H), (1, H_p), jnp.float32)
    b2_p = _pad_cast(b2.reshape(1, O), (1, O_p), jnp.float32)

    cost = pl.CostEstimate(
        flops=int(2 * n_i * TM * (I * H_p + H_p * O_p)),
        transcendentals=0,
        bytes_accessed=int(x.size * x.dtype.itemsize
                           + (w1_p.size + w2_p.size) * itm
                           + (b1_p.size + b2_p.size) * 4
                           + B * O_p * 4),
    )

    def _build_call(single_buffer_resident):
        mode = pl.Buffered(buffer_count=1) if single_buffer_resident else None

        def const_spec(shape):
            if mode is None:
                return pl.BlockSpec(shape, lambda i, k: (0, 0))
            return pl.BlockSpec(shape, lambda i, k: (0, 0), pipeline_mode=mode)

        if single_panel:                         # weights fully VMEM-resident
            w1_spec = const_spec((I, TH))
            b1_spec = const_spec((1, TH))
            w2_spec = const_spec((TH, O_p))
        else:                                    # stream H panels (large H)
            w1_spec = pl.BlockSpec((I, TH), lambda i, k: (0, k))
            b1_spec = pl.BlockSpec((1, TH), lambda i, k: (0, k))
            w2_spec = pl.BlockSpec((TH, O_p), lambda i, k: (k, 0))
        b2_spec = const_spec((1, O_p))

        return pl.pallas_call(
            mlp_kernel,
            out_shape=jax.ShapeDtypeStruct((B, O_p), jnp.float32),
            grid=(n_i, n_k),
            in_specs=[
                pl.BlockSpec((TM, I), lambda i, k: (i, 0)),   # x batch tile
                w1_spec, b1_spec, w2_spec, b2_spec,
            ],
            out_specs=pl.BlockSpec((TM, O_p), lambda i, k: (i, 0)),
            scratch_shapes=[pltpu.VMEM((TM, O_p), jnp.float32)],
            compiler_params=pltpu.CompilerParams(
                dimension_semantics=("parallel", "arbitrary"),
                vmem_limit_bytes=int(vmem_cap),
            ),
            cost_estimate=cost,
        )

    try:
        # Single-buffer the constant-index (DMA'd-once) operands.
        out_p = _build_call(True)(x, w1_p, b1_p, w2_p, b2_p)
    except Exception:
        # Fallback for JAX versions where pipeline_mode=Buffered(1) isn't
        # supported by the main pallas_call pipeline (default double-buffering).
        out_p = _build_call(False)(x, w1_p, b1_p, w2_p, b2_p)

    # TODO(synk): if the consumer is another kernel, hand it the lane-dense
    # padded (B, O_p) output and slice lazily to avoid this extra strided read.
    return out_p[:, :O]


def init_params(key, input_size, hidden_size, output_size):
    """Deterministic init mimicking PyTorch nn.Linear default (U(+/- 1/sqrt(fan_in))).
    Weights stored pre-transposed: (in_features, out_features); biases (out_features,)."""
    k1, k2, k3, k4 = jax.random.split(key, 4)
    lim1 = 1.0 / jnp.sqrt(jnp.float32(input_size))
    lim2 = 1.0 / jnp.sqrt(jnp.float32(hidden_size))
    w1 = jax.random.uniform(k1, (input_size, hidden_size), jnp.float32, -lim1, lim1)
    b1 = jax.random.uniform(k2, (hidden_size,), jnp.float32, -lim1, lim1)
    w2 = jax.random.uniform(k3, (hidden_size, output_size), jnp.float32, -lim2, lim2)
    b2 = jax.random.uniform(k4, (output_size,), jnp.float32, -lim2, lim2)
    return w1, b1, w2, b2


if __name__ == "__main__":
    # Small shapes consistent with the module: input_size=4, hidden_size=10, output_size=1.
    input_size, hidden_size, output_size = 4, 10, 1
    batch = 8

    key = jax.random.PRNGKey(0)
    kx, kp = jax.random.split(key)
    x = jax.random.normal(kx, (batch, input_size), jnp.float32)
    w1, b1, w2, b2 = init_params(kp, input_size, hidden_size, output_size)

    out = red_neuronal_forward(x, w1, b1, w2, b2)
    out = jax.block_until_ready(out)
    assert out.shape == (batch, output_size)

    # Reference mirroring the kernel's bf16-operand / f32-accumulate math.
    xb = x.astype(jnp.bfloat16).astype(jnp.float32)
    w1b = w1.astype(jnp.bfloat16).astype(jnp.float32)
    w2b = w2.astype(jnp.bfloat16).astype(jnp.float32)
    h_ref = jnp.maximum(xb @ w1b + b1.reshape(1, -1), 0.0)
    ref_bf16 = h_ref.astype(jnp.bfloat16).astype(jnp.float32) @ w2b + b2.reshape(1, -1)
    assert jnp.allclose(out, ref_bf16, atol=1e-3, rtol=1e-3)

    # Loose check against the exact f32 PyTorch-equivalent forward.
    ref_f32 = jnp.maximum(x @ w1 + b1.reshape(1, -1), 0.0) @ w2 + b2.reshape(1, -1)
    assert jnp.allclose(out, ref_f32, atol=5e-2, rtol=5e-2)

    print("KERNEL_OK")
</pallas_src>

<mosaic_0001>
module attributes {stable_mosaic.version = 11 : i64} {
  func.func @mlp_kernel(%arg0: i32, %arg1: i32, %arg2: memref<16x4xf32, #tpu.memory_space<vmem>>, %arg3: memref<4x128xbf16, #tpu.memory_space<vmem>>, %arg4: memref<1x128xf32, #tpu.memory_space<vmem>>, %arg5: memref<128x128xbf16, #tpu.memory_space<vmem>>, %arg6: memref<1x128xf32, #tpu.memory_space<vmem>>, %arg7: memref<16x128xf32, #tpu.memory_space<vmem>>, %arg8: memref<16x128xf32, #tpu.memory_space<vmem>>) attributes {dimension_semantics = [#tpu.dimension_semantics<parallel>, #tpu.dimension_semantics<arbitrary>], iteration_bounds = array<i64: 1, 1>, scalar_prefetch = 0 : i64, scratch_operands = 1 : i64, tpu.core_type = #tpu.core_type<tc>, window_params = [{transform_indices = @transform_0, window_bounds = array<i64: 16, 4>}, {pipeline_mode = #tpu.pipeline_mode<synchronous>, transform_indices = @transform_1, window_bounds = array<i64: 4, 128>}, {pipeline_mode = #tpu.pipeline_mode<synchronous>, transform_indices = @transform_2, window_bounds = array<i64: 1, 128>}, {pipeline_mode = #tpu.pipeline_mode<synchronous>, transform_indices = @transform_3, window_bounds = array<i64: 128, 128>}, {pipeline_mode = #tpu.pipeline_mode<synchronous>, transform_indices = @transform_4, window_bounds = array<i64: 1, 128>}, {transform_indices = @transform_5, window_bounds = array<i64: 16, 128>}]} {
    %c0_i32 = arith.constant 0 : i32
    %0 = arith.cmpi eq, %arg1, %c0_i32 : i32
    %1 = arith.extui %0 : i1 to i32
    %c0_i32_0 = arith.constant 0 : i32
    %2 = arith.cmpi ne, %1, %c0_i32_0 : i32
    scf.if %2 {
      %cst_16 = arith.constant 0.000000e+00 : f32
      %21 = vector.broadcast %cst_16 : f32 to vector<16x128xf32>
      %c0_17 = arith.constant 0 : index
      %c0_18 = arith.constant 0 : index
      %22 = vector.load %arg8[%c0_17, %c0_18] : memref<16x128xf32, #tpu.memory_space<vmem>>, vector<16x128xf32>
      tpu.vector_store %arg8[%c0_17, %c0_18], %21 {strides = array<i32>} : memref<16x128xf32, #tpu.memory_space<vmem>>, vector<16x128xf32>,
    } else {
    }
    %c0 = arith.constant 0 : index
    %c0_1 = arith.constant 0 : index
    %3 = vector.load %arg2[%c0, %c0_1] : memref<16x4xf32, #tpu.memory_space<vmem>>, vector<16x4xf32>
    %4 = arith.truncf %3 : vector<16x4xf32> to vector<16x4xbf16>
    %c0_2 = arith.constant 0 : index
    %c0_3 = arith.constant 0 : index
    %5 = vector.load %arg3[%c0_2, %c0_3] : memref<4x128xbf16, #tpu.memory_space<vmem>>, vector<4x128xbf16>
    %cst = arith.constant dense<0.000000e+00> : vector<16x128xf32>
    %6 = tpu.matmul %4, %5, %cst {dimension_numbers = #tpu.dot_dimension_numbers<[1], [0], [0], [1], [0, 0, 1, 1], [], []>} : vector<16x4xbf16>, vector<4x128xbf16>, vector<16x128xf32> -> vector<16x128xf32>
    %c0_4 = arith.constant 0 : index
    %c0_5 = arith.constant 0 : index
    %7 = vector.load %arg4[%c0_4, %c0_5] : memref<1x128xf32, #tpu.memory_space<vmem>>, vector<1x128xf32>
    %8 = vector.broadcast %7 : vector<1x128xf32> to vector<16x128xf32>
    %9 = arith.addf %6, %8 : vector<16x128xf32>
    %cst_6 = arith.constant 0.000000e+00 : f32
    %10 = vector.broadcast %cst_6 : f32 to vector<16x128xf32>
    %11 = arith.maximumf %9, %10 : vector<16x128xf32>
    %c0_7 = arith.constant 0 : index
    %c0_8 = arith.constant 0 : index
    %12 = vector.load %arg8[%c0_7, %c0_8] : memref<16x128xf32, #tpu.memory_space<vmem>>, vector<16x128xf32>
    %13 = arith.truncf %11 : vector<16x128xf32> to vector<16x128xbf16>
    %c0_9 = arith.constant 0 : index
    %c0_10 = arith.constant 0 : index
    %14 = vector.load %arg5[%c0_9, %c0_10] : memref<128x128xbf16, #tpu.memory_space<vmem>>, vector<128x128xbf16>
    %cst_11 = arith.constant dense<0.000000e+00> : vector<16x128xf32>
    %15 = tpu.matmul %13, %14, %cst_11 {dimension_numbers = #tpu.dot_dimension_numbers<[1], [0], [0], [1], [0, 0, 1, 1], [], []>} : vector<16x128xbf16>, vector<128x128xbf16>, vector<16x128xf32> -> vector<16x128xf32>
    %16 = arith.addf %12, %15 : vector<16x128xf32>
    %c0_12 = arith.constant 0 : index
    %c0_13 = arith.constant 0 : index
    %17 = vector.load %arg8[%c0_12, %c0_13] : memref<16x128xf32, #tpu.memory_space<vmem>>, vector<16x128xf32>
    tpu.vector_store %arg8[%c0_12, %c0_13], %16 {strides = array<i32>} : memref<16x128xf32, #tpu.memory_space<vmem>>, vector<16x128xf32>,
    %c0_i32_14 = arith.constant 0 : i32
    %18 = arith.cmpi eq, %arg1, %c0_i32_14 : i32
    %19 = arith.extui %18 : i1 to i32
    %c0_i32_15 = arith.constant 0 : i32
    %20 = arith.cmpi ne, %19, %c0_i32_15 : i32
    scf.if %20 {
      %c0_16 = arith.constant 0 : index
      %c0_17 = arith.constant 0 : index
      %21 = vector.load %arg8[%c0_16, %c0_17] : memref<16x128xf32, #tpu.memory_space<vmem>>, vector<16x128xf32>
      %c0_18 = arith.constant 0 : index
      %c0_19 = arith.constant 0 : index
      %22 = vector.load %arg6[%c0_18, %c0_19] : memref<1x128xf32, #tpu.memory_space<vmem>>, vector<1x128xf32>
      %23 = vector.broadcast %22 : vector<1x128xf32> to vector<16x128xf32>
      %24 = arith.addf %21, %23 : vector<16x128xf32>
      %c0_20 = arith.constant 0 : index
      %c0_21 = arith.constant 0 : index
      %25 = vector.load %arg7[%c0_20, %c0_21] : memref<16x128xf32, #tpu.memory_space<vmem>>, vector<16x128xf32>
      tpu.vector_store %arg7[%c0_20, %c0_21], %24 {strides = array<i32>} : memref<16x128xf32, #tpu.memory_space<vmem>>, vector<16x128xf32>,
    } else {
    }
    return
  }
  func.func @transform_0(%arg0: i32, %arg1: i32) -> (i32, i32) {
    %c0_i32 = arith.constant 0 : i32
    %c0_i32_0 = arith.constant 0 : i32
    return %arg0, %c0_i32 : i32, i32
  }
  func.func @transform_1(%arg0: i32, %arg1: i32) -> (i32, i32) {
    %c0_i32 = arith.constant 0 : i32
    %c0_i32_0 = arith.constant 0 : i32
    %c0_i32_1 = arith.constant 0 : i32
    return %c0_i32, %c0_i32_0 : i32, i32
  }
  func.func @transform_2(%arg0: i32, %arg1: i32) -> (i32, i32) {
    %c0_i32 = arith.constant 0 : i32
    %c0_i32_0 = arith.constant 0 : i32
    %c0_i32_1 = arith.constant 0 : i32
    return %c0_i32, %c0_i32_0 : i32, i32
  }
  func.func @transform_3(%arg0: i32, %arg1: i32) -> (i32, i32) {
    %c0_i32 = arith.constant 0 : i32
    %c0_i32_0 = arith.constant 0 : i32
    %c0_i32_1 = arith.constant 0 : i32
    return %c0_i32, %c0_i32_0 : i32, i32
  }
  func.func @transform_4(%arg0: i32, %arg1: i32) -> (i32, i32) {
    %c0_i32 = arith.constant 0 : i32
    %c0_i32_0 = arith.constant 0 : i32
    %c0_i32_1 = arith.constant 0 : i32
    return %c0_i32, %c0_i32_0 : i32, i32
  }
  func.func @transform_5(%arg0: i32, %arg1: i32) -> (i32, i32) {
    %c0_i32 = arith.constant 0 : i32
    %c0_i32_0 = arith.constant 0 : i32
    return %arg0, %c0_i32 : i32, i32
  }
}

module attributes {stable_mosaic.version = 11 : i64} {
  func.func @mlp_kernel(%arg0: i32, %arg1: i32, %arg2: memref<16x4xf32, #tpu.memory_space<vmem>>, %arg3: memref<4x128xbf16, #tpu.memory_space<vmem>>, %arg4: memref<1x128xf32, #tpu.memory_space<vmem>>, %arg5: memref<128x128xbf16, #tpu.memory_space<vmem>>, %arg6: memref<1x128xf32, #tpu.memory_space<vmem>>, %arg7: memref<16x128xf32, #tpu.memory_space<vmem>>, %arg8: memref<16x128xf32, #tpu.memory_space<vmem>>) attributes {dimension_semantics = [#tpu.dimension_semantics<parallel>, #tpu.dimension_semantics<arbitrary>], iteration_bounds = array<i64: 1, 1>, scalar_prefetch = 0 : i64, scratch_operands = 1 : i64, tpu.core_type = #tpu.core_type<tc>, window_params = [{transform_indices = @transform_0, window_bounds = array<i64: 16, 4>}, {pipeline_mode = #tpu.pipeline_mode<synchronous>, transform_indices = @transform_1, window_bounds = array<i64: 4, 128>}, {pipeline_mode = #tpu.pipeline_mode<synchronous>, transform_indices = @transform_2, window_bounds = array<i64: 1, 128>}, {pipeline_mode = #tpu.pipeline_mode<synchronous>, transform_indices = @transform_3, window_bounds = array<i64: 128, 128>}, {pipeline_mode = #tpu.pipeline_mode<synchronous>, transform_indices = @transform_4, window_bounds = array<i64: 1, 128>}, {transform_indices = @transform_5, window_bounds = array<i64: 16, 128>}]} {
    %c0_i32 = arith.constant 0 : i32
    %0 = arith.cmpi eq, %arg1, %c0_i32 : i32
    %1 = arith.extui %0 : i1 to i32
    %c0_i32_0 = arith.constant 0 : i32
    %2 = arith.cmpi ne, %1, %c0_i32_0 : i32
    scf.if %2 {
      %cst_16 = arith.constant 0.000000e+00 : f32
      %21 = vector.broadcast %cst_16 : f32 to vector<16x128xf32>
      %c0_17 = arith.constant 0 : index
      %c0_18 = arith.constant 0 : index
      %22 = vector.load %arg8[%c0_17, %c0_18] : memref<16x128xf32, #tpu.memory_space<vmem>>, vector<16x128xf32>
      tpu.vector_store %arg8[%c0_17, %c0_18], %21 {strides = array<i32>} : memref<16x128xf32, #tpu.memory_space<vmem>>, vector<16x128xf32>,
    } else {
    }
    %c0 = arith.constant 0 : index
    %c0_1 = arith.constant 0 : index
    %3 = vector.load %arg2[%c0, %c0_1] : memref<16x4xf32, #tpu.memory_space<vmem>>, vector<16x4xf32>
    %4 = arith.truncf %3 : vector<16x4xf32> to vector<16x4xbf16>
    %c0_2 = arith.constant 0 : index
    %c0_3 = arith.constant 0 : index
    %5 = vector.load %arg3[%c0_2, %c0_3] : memref<4x128xbf16, #tpu.memory_space<vmem>>, vector<4x128xbf16>
    %cst = arith.constant dense<0.000000e+00> : vector<16x128xf32>
    %6 = tpu.matmul %4, %5, %cst {dimension_numbers = #tpu.dot_dimension_numbers<[1], [0], [0], [1], [0, 0, 1, 1], [], []>} : vector<16x4xbf16>, vector<4x128xbf16>, vector<16x128xf32> -> vector<16x128xf32>
    %c0_4 = arith.constant 0 : index
    %c0_5 = arith.constant 0 : index
    %7 = vector.load %arg4[%c0_4, %c0_5] : memref<1x128xf32, #tpu.memory_space<vmem>>, vector<1x128xf32>
    %8 = vector.broadcast %7 : vector<1x128xf32> to vector<16x128xf32>
    %9 = arith.addf %6, %8 : vector<16x128xf32>
    %cst_6 = arith.constant 0.000000e+00 : f32
    %10 = vector.broadcast %cst_6 : f32 to vector<16x128xf32>
    %11 = arith.maximumf %9, %10 : vector<16x128xf32>
    %c0_7 = arith.constant 0 : index
    %c0_8 = arith.constant 0 : index
    %12 = vector.load %arg8[%c0_7, %c0_8] : memref<16x128xf32, #tpu.memory_space<vmem>>, vector<16x128xf32>
    %13 = arith.truncf %11 : vector<16x128xf32> to vector<16x128xbf16>
    %c0_9 = arith.constant 0 : index
    %c0_10 = arith.constant 0 : index
    %14 = vector.load %arg5[%c0_9, %c0_10] : memref<128x128xbf16, #tpu.memory_space<vmem>>, vector<128x128xbf16>
    %cst_11 = arith.constant dense<0.000000e+00> : vector<16x128xf32>
    %15 = tpu.matmul %13, %14, %cst_11 {dimension_numbers = #tpu.dot_dimension_numbers<[1], [0], [0], [1], [0, 0, 1, 1], [], []>} : vector<16x128xbf16>, vector<128x128xbf16>, vector<16x128xf32> -> vector<16x128xf32>
    %16 = arith.addf %12, %15 : vector<16x128xf32>
    %c0_12 = arith.constant 0 : index
    %c0_13 = arith.constant 0 : index
    %17 = vector.load %arg8[%c0_12, %c0_13] : memref<16x128xf32, #tpu.memory_space<vmem>>, vector<16x128xf32>
    tpu.vector_store %arg8[%c0_12, %c0_13], %16 {strides = array<i32>} : memref<16x128xf32, #tpu.memory_space<vmem>>, vector<16x128xf32>,
    %c0_i32_14 = arith.constant 0 : i32
    %18 = arith.cmpi eq, %arg1, %c0_i32_14 : i32
    %19 = arith.extui %18 : i1 to i32
    %c0_i32_15 = arith.constant 0 : i32
    %20 = arith.cmpi ne, %19, %c0_i32_15 : i32
    scf.if %20 {
      %c0_16 = arith.constant 0 : index
      %c0_17 = arith.constant 0 : index
      %21 = vector.load %arg8[%c0_16, %c0_17] : memref<16x128xf32, #tpu.memory_space<vmem>>, vector<16x128xf32>
      %c0_18 = arith.constant 0 : index
      %c0_19 = arith.constant 0 : index
      %22 = vector.load %arg6[%c0_18, %c0_19] : memref<1x128xf32, #tpu.memory_space<vmem>>, vector<1x128xf32>
      %23 = vector.broadcast %22 : vector<1x128xf32> to vector<16x128xf32>
      %24 = arith.addf %21, %23 : vector<16x128xf32>
      %c0_20 = arith.constant 0 : index
      %c0_21 = arith.constant 0 : index
      %25 = vector.load %arg7[%c0_20, %c0_21] : memref<16x128xf32, #tpu.memory_space<vmem>>, vector<16x128xf32>
      tpu.vector_store %arg7[%c0_20, %c0_21], %24 {strides = array<i32>} : memref<16x128xf32, #tpu.memory_space<vmem>>, vector<16x128xf32>,
    } else {
    }
    return
  }
  func.func @transform_0(%arg0: i32, %arg1: i32) -> (i32, i32) {
    %c0_i32 = arith.constant 0 : i32
    %c0_i32_0 = arith.constant 0 : i32
    return %arg0, %c0_i32 : i32, i32
  }
  func.func @transform_1(%arg0: i32, %arg1: i32) -> (i32, i32) {
    %c0_i32 = arith.constant 0 : i32
    %c0_i32_0 = arith.constant 0 : i32
    %c0_i32_1 = arith.constant 0 : i32
    return %c0_i32, %c0_i32_0 : i32, i32
  }
  func.func @transform_2(%arg0: i32, %arg1: i32) -> (i32, i32) {
    %c0_i32 = arith.constant 0 : i32
    %c0_i32_0 = arith.constant 0 : i32
    %c0_i32_1 = arith.constant 0 : i32
    return %c0_i32, %c0_i32_0 : i32, i32
  }
  func.func @transform_3(%arg0: i32, %arg1: i32) -> (i32, i32) {
    %c0_i32 = arith.constant 0 : i32
    %c0_i32_0 = arith.constant 0 : i32
    %c0_i32_1 = arith.constant 0 : i32
    return %c0_i32, %c0_i32_0 : i32, i32
  }
  func.func @transform_4(%arg0: i32, %arg1: i32) -> (i32, i32) {
    %c0_i32 = arith.constant 0 : i32
    %c0_i32_0 = arith.constant 0 : i32
    %c0_i32_1 = arith.constant 0 : i32
    return %c0_i32, %c0_i32_0 : i32, i32
  }
  func.func @transform_5(%arg0: i32, %arg1: i32) -> (i32, i32) {
    %c0_i32 = arith.constant 0 : i32
    %c0_i32_0 = arith.constant 0 : i32
    return %arg0, %c0_i32 : i32, i32
  }
}

</mosaic_0001>

<bundles_post_ra>
// kernel: tpu_custom_call.1
= control target key start
LH: loop header
LB: loop body
LE: loop exit
PB: predicated region body
PF: predicated region fallthrough
CT: control target
= control target key end

     0   :  { %10 = vsyncpa [#allocation4], 0  ;;  %s438_s0 = inlined_call_operand.vmem [shape: f32[8,4], index: 0, kind: input, shape index: {}]   ;;  %s439_s1 = inlined_call_operand.vmem [shape: bf16[4,128], index: 1, kind: input, shape index: {}]   ;;  %s440_s2 = inlined_call_operand.vmem [shape: f32[1,128], index: 2, kind: input, shape index: {}]   ;;  %s441_s3 = inlined_call_operand.hbm [shape: bf16[128,128], index: 3, kind: input, shape index: {}]   ;;  %s442_s4 = inlined_call_operand.vmem [shape: f32[1,128], index: 4, kind: input, shape index: {}]   ;;  %s443_s5 = inlined_call_operand.hbm [shape: f32[8,128], index: 5, kind: output, shape index: {}]  }
   0x1   :  { %11 = vsyncpa [#allocation5], 0  ;;  %s361_s18 = smov [#allocation3]   ;;  %s313_s22 = scalar_lea.hbm %s441_s3, 1024 }
   0x2   :  { %s23_s19 = sshll.u32 %s361_s18, 4  ;;  %p314_p0 = scmp.ne.s32.totalorder %s441_s3, %s313_s22  ;;  %s24_s19 = int_to_ptr.vmem [resolvable:$true] %s23_s19 }
   0x3   :  { %p317_p1 = scmp.lt.u32.totalorder %s313_s22, %s441_s3 }
   0x5   :  { %p319_p2 = pnand %p317_p1, %p314_p0 }
   0x7   :  { %322 = shalt.err (!%p319_p2)
}
   0x8   :  { %s323_s27 = scalar_lea.vmem %s24_s19, 1024  ;;  %p328_p4 = scmp.lt.s32.totalorder %s24_s19, %s24_s19 }
   0x9   :  { %p324_p3 = scmp.ne.s32.totalorder %s24_s19, %s323_s27  ;;  %p329_p5 = scmp.lt.s32.totalorder %s323_s27, %s323_s27 }
   0xb   :  { %p330_p6 = por %p329_p5, %p328_p4 }
   0xd   :  { %p331_p7 = pnand %p330_p6, %p324_p3 }
   0xf   :  { %334 = shalt.err (!%p331_p7)
}
  0x10   :  { %s362_s28 = smov 64   ;;  %s363_s29 = smov 4  }
  0x11   :  { %29 = dma.hbm_to_vmem [thread:$0]  %s441_s3, 1024, %s24_s19, [#allocation4], %s362_s28, %s362_s28, %s363_s29  }
  0x12   :  { %357 = dma.done.wait [#allocation4], 1024  }
  0x13   :  { %358 = vsyncadd [#allocation4], 4294966272  ;;  %v364_v0 = vmov 0.0   ;;  %vm365_vm0 = vmmov 0   ;;  %vm57_vm1 = vcmask 1041408   ;;  %v42_v2 = vld [vmem:[%s438_s0] sm:$0xff] }
  0x14   :  { %271 = vmatprep.subr.bf16.mxu0 %v364_v0  ;;  %273 = vmatprep.mubr.msk.bf16.mxu0 %vm365_vm0, %v364_v0  ;;  %v45_v1 = vld [vmem:[%s439_s1] sm:$0x3]  ;;  %v43_v3 = vld [vmem:[%s438_s0 + $0x8] sm:$0xff]  ;;  %vm53_vm2 = vcmask 31744   ;;  %v307_v8 = vld [vmem:[#allocation3 + $0x10] sm:$0xff]  }
  0x15   :  { %277 = vmatprep.subr.bf16.mxu1 %v364_v0  ;;  %293 = vmatprep.mubr.msk.bf16.mxu1 %vm365_vm0, %v364_v0  ;;  %v59_v4 = vsel %vm57_vm1, %v45_v1, 0  ;;  %v44_v5 = vpack.c.bf16 %v43_v3, %v42_v2  ;;  %v305_v6 = vld [vmem:[#allocation3] sm:$0xff]   ;;  %v306_v7 = vld [vmem:[#allocation3 + $0x8] sm:$0xff]   ;;  %v308_v9 = vld [vmem:[#allocation3 + $0x18] sm:$0xff]  }
  0x16   :  { %272 = vmatpush3.bf16.msra.mxu0 %v59_v4  ;;  %278 = vmatpush3.bf16.msra.mxu1 %v305_v6  ;;  %v309_v10 = vld [vmem:[#allocation3 + $0x20] sm:$0xff]   ;;  %v310_v11 = vld [vmem:[#allocation3 + $0x28] sm:$0xff]   ;;  %v311_v12 = vld [vmem:[#allocation3 + $0x30] sm:$0xff]  }
  0x17   :  { %279 = vmatprep.subr.bf16.mxu1 %v364_v0  ;;  %v312_v13 = vld [vmem:[#allocation3 + $0x38] sm:$0xff]   ;;  %v249_v14 = vld [vmem:[%s440_s2] ss:$0 sm:$0xff] }
  0x18   :  { %v259_v24 = vld [vmem:[%s442_s4] ss:$0 sm:$0xff] }
  0x19   :  { %274 = vmatmul.mubr.msk.bf16.vlgmr.msra.gmra.mrb[0].mxu0 %vm53_vm2, %v44_v5 }
  0x1a   :  { %280 = vmatpush3.bf16.msra.mxu1 %v306_v7 }
  0x1b   :  { %281 = vmatprep.subr.bf16.mxu1 %v364_v0 }
  0x1e   :  { %282 = vmatpush3.bf16.msra.mxu1 %v307_v8 }
  0x1f   :  { %283 = vmatprep.subr.bf16.mxu1 %v364_v0 }
  0x22   :  { %284 = vmatpush3.bf16.msra.mxu1 %v308_v9 }
  0x23   :  { %285 = vmatprep.subr.bf16.mxu1 %v364_v0 }
  0x26   :  { %286 = vmatpush3.bf16.msra.mxu1 %v309_v10 }
  0x27   :  { %287 = vmatprep.subr.bf16.mxu1 %v364_v0 }
  0x2a   :  { %288 = vmatpush3.bf16.msra.mxu1 %v310_v11 }
  0x2b   :  { %289 = vmatprep.subr.bf16.mxu1 %v364_v0 }
  0x2e   :  { %290 = vmatpush3.bf16.msra.mxu1 %v311_v12 }
  0x2f   :  { %291 = vmatprep.subr.bf16.mxu1 %v364_v0 }
  0x32   :  { %292 = vmatpush3.bf16.msra.mxu1 %v312_v13 }
  0xec   :  { %v95_v15 = vpop.f32.mrb[0].mxu0 }
  0xed   :  { %v96_v16 = vadd.f32 %v249_v14, %v95_v15  ;;  %v275_v17 = vpop.f32.mrb[1].mxu0 }
  0xee   :  { %v98_v18 = vpop.f32.mrb[2].mxu0 }
  0xef   :  { %v99_v19 = vadd.f32 %v249_v14, %v98_v18  ;;  %v276_v20 = vpop.f32.mrb[3].mxu0  ;;  %v102_v21 = vmax.f32 %v96_v16, 0.0 }
  0xf1   :  { %v103_v22 = vmax.f32 %v99_v19, 0.0 }
  0xf3   :  { %v106_v23 = vpack.c.bf16 %v103_v22, %v102_v21 }
  0xf5   :  { %294 = vmatmul.mubr.bf16.vlgmr.msra.gmra.mrb[0].mxu1 %v106_v23 }
 0x1c8   :  { %v205_v25 = vpop.f32.mrb[0].mxu1 }
 0x1c9   :  { %v228_v26 = vadd.f32 %v259_v24, %v205_v25  ;;  %v295_v27 = vpop.f32.mrb[1].mxu1 }
 0x1ca   :  { %v208_v28 = vpop.f32.mrb[2].mxu1 }
 0x1cb   :  { %230 = vst [vmem:[#allocation6] sm:$0xff] %v228_v26  ;;  %v229_v29 = vadd.f32 %v259_v24, %v208_v28  ;;  %v296_v30 = vpop.f32.mrb[3].mxu1 }
 0x1cd   :  { %231 = vst [vmem:[#allocation6 + $0x8] sm:$0xff] %v229_v29 }
 0x1ce   :  { %236 = vsyncadd [#allocation5], 128  ;;  %s366_s2 = smov [#allocation6]  }
 0x1cf   :  { %s237_s14 = sshll.u32 %s366_s2, 4  ;;  %s238_s14 = int_to_ptr.vmem [resolvable:$true] %s237_s14 }
 0x1d0   :  { %s335_s15 = scalar_lea.vmem %s238_s14, 128  ;;  %s339_s16 = scalar_lea.vmem %s238_s14, 256 }
 0x1d1   :  { %p336_p8 = scmp.ne.s32.totalorder %s238_s14, %s335_s15  ;;  %p340_p9 = scmp.lt.s32.totalorder %s238_s14, %s238_s14 }
 0x1d2   :  { %p341_p10 = scmp.lt.s32.totalorder %s339_s16, %s335_s15 }
 0x1d4   :  { %p342_p11 = por %p341_p10, %p340_p9 }
 0x1d6   :  { %p343_p12 = pnand %p342_p11, %p336_p8 }
 0x1d8   :  { %346 = shalt.err (!%p343_p12)
}
 0x1d9   :  { %s347_s18 = scalar_lea.hbm %s443_s5, 128 }
 0x1da   :  { %p348_p13 = scmp.ne.s32.totalorder %s443_s5, %s347_s18  ;;  %p351_p0 = scmp.lt.u32.totalorder %s347_s18, %s443_s5 }
 0x1dc   :  { %p353_p1 = pnand %p351_p0, %p348_p13 }
 0x1de   :  { %356 = shalt.err (!%p353_p1)
}
 0x1df   :  { %s367_s23 = smov 128   ;;  %s368_s24 = smov 8  }
 0x1e0   :  { %243 = dma.vmem_to_hbm [thread:$0]  %s238_s14, 128, %s443_s5, [#allocation5], %s367_s23, %s367_s23, %s368_s24  }
 0x1e1   :  { %359 = dma.done.wait [#allocation5], 256  }
 0x1e2   :  { %360 = vsyncadd [#allocation5], 4294967040 }
 0x1e3   :  { %247 = vsyncpa [#allocation4], 1 }
 0x1e4   :  { %248 = vsyncpa [#allocation5], 1 }

// kernel: tpu_custom_call.1
= control target key start
LH: loop header
LB: loop body
LE: loop exit
PB: predicated region body
PF: predicated region fallthrough
CT: control target
= control target key end

     0   :  { %10 = vsyncpa [#allocation4], 0  ;;  %s438_s0 = inlined_call_operand.vmem [shape: f32[8,4], index: 0, kind: input, shape index: {}]   ;;  %s439_s1 = inlined_call_operand.vmem [shape: bf16[4,128], index: 1, kind: input, shape index: {}]   ;;  %s440_s2 = inlined_call_operand.vmem [shape: f32[1,128], index: 2, kind: input, shape index: {}]   ;;  %s441_s3 = inlined_call_operand.hbm [shape: bf16[128,128], index: 3, kind: input, shape index: {}]   ;;  %s442_s4 = inlined_call_operand.vmem [shape: f32[1,128], index: 4, kind: input, shape index: {}]   ;;  %s443_s5 = inlined_call_operand.hbm [shape: f32[8,128], index: 5, kind: output, shape index: {}]  }
   0x1   :  { %11 = vsyncpa [#allocation5], 0  ;;  %s361_s18 = smov [#allocation3]   ;;  %s313_s22 = scalar_lea.hbm %s441_s3, 1024 }
   0x2   :  { %s23_s19 = sshll.u32 %s361_s18, 4  ;;  %p314_p0 = scmp.ne.s32.totalorder %s441_s3, %s313_s22  ;;  %s24_s19 = int_to_ptr.vmem [resolvable:$true] %s23_s19 }
   0x3   :  { %p317_p1 = scmp.lt.u32.totalorder %s313_s22, %s441_s3 }
   0x5   :  { %p319_p2 = pnand %p317_p1, %p314_p0 }
   0x7   :  { %322 = shalt.err (!%p319_p2)
}
   0x8   :  { %s323_s27 = scalar_lea.vmem %s24_s19, 1024  ;;  %p328_p4 = scmp.lt.s32.totalorder %s24_s19, %s24_s19 }
   0x9   :  { %p324_p3 = scmp.ne.s32.totalorder %s24_s19, %s323_s27  ;;  %p329_p5 = scmp.lt.s32.totalorder %s323_s27, %s323_s27 }
   0xb   :  { %p330_p6 = por %p329_p5, %p328_p4 }
   0xd   :  { %p331_p7 = pnand %p330_p6, %p324_p3 }
   0xf   :  { %334 = shalt.err (!%p331_p7)
}
  0x10   :  { %s362_s28 = smov 64   ;;  %s363_s29 = smov 4  }
  0x11   :  { %29 = dma.hbm_to_vmem [thread:$0]  %s441_s3, 1024, %s24_s19, [#allocation4], %s362_s28, %s362_s28, %s363_s29  }
  0x12   :  { %357 = dma.done.wait [#allocation4], 1024  }
  0x13   :  { %358 = vsyncadd [#allocation4], 4294966272  ;;  %v364_v0 = vmov 0.0   ;;  %vm365_vm0 = vmmov 0   ;;  %vm57_vm1 = vcmask 1041408   ;;  %v42_v2 = vld [vmem:[%s438_s0] sm:$0xff] }
  0x14   :  { %271 = vmatprep.subr.bf16.mxu0 %v364_v0  ;;  %273 = vmatprep.mubr.msk.bf16.mxu0 %vm365_vm0, %v364_v0  ;;  %v45_v1 = vld [vmem:[%s439_s1] sm:$0x3]  ;;  %v43_v3 = vld [vmem:[%s438_s0 + $0x8] sm:$0xff]  ;;  %vm53_vm2 = vcmask 31744   ;;  %v307_v8 = vld [vmem:[#allocation3 + $0x10] sm:$0xff]  }
  0x15   :  { %277 = vmatprep.subr.bf16.mxu1 %v364_v0  ;;  %293 = vmatprep.mubr.msk.bf16.mxu1 %vm365_vm0, %v364_v0  ;;  %v59_v4 = vsel %vm57_vm1, %v45_v1, 0  ;;  %v44_v5 = vpack.c.bf16 %v43_v3, %v42_v2  ;;  %v305_v6 = vld [vmem:[#allocation3] sm:$0xff]   ;;  %v306_v7 = vld [vmem:[#allocation3 + $0x8] sm:$0xff]   ;;  %v308_v9 = vld [vmem:[#allocation3 + $0x18] sm:$0xff]  }
  0x16   :  { %272 = vmatpush3.bf16.msra.mxu0 %v59_v4  ;;  %278 = vmatpush3.bf16.msra.mxu1 %v305_v6  ;;  %v309_v10 = vld [vmem:[#allocation3 + $0x20] sm:$0xff]   ;;  %v310_v11 = vld [vmem:[#allocation3 + $0x28] sm:$0xff]   ;;  %v311_v12 = vld [vmem:[#allocation3 + $0x30] sm:$0xff]  }
  0x17   :  { %279 = vmatprep.subr.bf16.mxu1 %v364_v0  ;;  %v312_v13 = vld [vmem:[#allocation3 + $0x38] sm:$0xff]   ;;  %v249_v14 = vld [vmem:[%s440_s2] ss:$0 sm:$0xff] }
  0x18   :  { %v259_v24 = vld [vmem:[%s442_s4] ss:$0 sm:$0xff] }
  0x19   :  { %274 = vmatmul.mubr.msk.bf16.vlgmr.msra.gmra.mrb[0].mxu0 %vm53_vm2, %v44_v5 }
  0x1a   :  { %280 = vmatpush3.bf16.msra.mxu1 %v306_v7 }
  0x1b   :  { %281 = vmatprep.subr.bf16.mxu1 %v364_v0 }
  0x1e   :  { %282 = vmatpush3.bf16.msra.mxu1 %v307_v8 }
  0x1f   :  { %283 = vmatprep.subr.bf16.mxu1 %v364_v0 }
  0x22   :  { %284 = vmatpush3.bf16.msra.mxu1 %v308_v9 }
  0x23   :  { %285 = vmatprep.subr.bf16.mxu1 %v364_v0 }
  0x26   :  { %286 = vmatpush3.bf16.msra.mxu1 %v309_v10 }
  0x27   :  { %287 = vmatprep.subr.bf16.mxu1 %v364_v0 }
  0x2a   :  { %288 = vmatpush3.bf16.msra.mxu1 %v310_v11 }
  0x2b   :  { %289 = vmatprep.subr.bf16.mxu1 %v364_v0 }
  0x2e   :  { %290 = vmatpush3.bf16.msra.mxu1 %v311_v12 }
  0x2f   :  { %291 = vmatprep.subr.bf16.mxu1 %v364_v0 }
  0x32   :  { %292 = vmatpush3.bf16.msra.mxu1 %v312_v13 }
  0xec   :  { %v95_v15 = vpop.f32.mrb[0].mxu0 }
  0xed   :  { %v96_v16 = vadd.f32 %v249_v14, %v95_v15  ;;  %v275_v17 = vpop.f32.mrb[1].mxu0 }
  0xee   :  { %v98_v18 = vpop.f32.mrb[2].mxu0 }
  0xef   :  { %v99_v19 = vadd.f32 %v249_v14, %v98_v18  ;;  %v276_v20 = vpop.f32.mrb[3].mxu0  ;;  %v102_v21 = vmax.f32 %v96_v16, 0.0 }
  0xf1   :  { %v103_v22 = vmax.f32 %v99_v19, 0.0 }
  0xf3   :  { %v106_v23 = vpack.c.bf16 %v103_v22, %v102_v21 }
  0xf5   :  { %294 = vmatmul.mubr.bf16.vlgmr.msra.gmra.mrb[0].mxu1 %v106_v23 }
 0x1c8   :  { %v205_v25 = vpop.f32.mrb[0].mxu1 }
 0x1c9   :  { %v228_v26 = vadd.f32 %v259_v24, %v205_v25  ;;  %v295_v27 = vpop.f32.mrb[1].mxu1 }
 0x1ca   :  { %v208_v28 = vpop.f32.mrb[2].mxu1 }
 0x1cb   :  { %230 = vst [vmem:[#allocation6] sm:$0xff] %v228_v26  ;;  %v229_v29 = vadd.f32 %v259_v24, %v208_v28  ;;  %v296_v30 = vpop.f32.mrb[3].mxu1 }
 0x1cd   :  { %231 = vst [vmem:[#allocation6 + $0x8] sm:$0xff] %v229_v29 }
 0x1ce   :  { %236 = vsyncadd [#allocation5], 128  ;;  %s366_s2 = smov [#allocation6]  }
 0x1cf   :  { %s237_s14 = sshll.u32 %s366_s2, 4  ;;  %s238_s14 = int_to_ptr.vmem [resolvable:$true] %s237_s14 }
 0x1d0   :  { %s335_s15 = scalar_lea.vmem %s238_s14, 128  ;;  %s339_s16 = scalar_lea.vmem %s238_s14, 256 }
 0x1d1   :  { %p336_p8 = scmp.ne.s32.totalorder %s238_s14, %s335_s15  ;;  %p340_p9 = scmp.lt.s32.totalorder %s238_s14, %s238_s14 }
 0x1d2   :  { %p341_p10 = scmp.lt.s32.totalorder %s339_s16, %s335_s15 }
 0x1d4   :  { %p342_p11 = por %p341_p10, %p340_p9 }
 0x1d6   :  { %p343_p12 = pnand %p342_p11, %p336_p8 }
 0x1d8   :  { %346 = shalt.err (!%p343_p12)
}
 0x1d9   :  { %s347_s18 = scalar_lea.hbm %s443_s5, 128 }
 0x1da   :  { %p348_p13 = scmp.ne.s32.totalorder %s443_s5, %s347_s18  ;;  %p351_p0 = scmp.lt.u32.totalorder %s347_s18, %s443_s5 }
 0x1dc   :  { %p353_p1 = pnand %p351_p0, %p348_p13 }
 0x1de   :  { %356 = shalt.err (!%p353_p1)
}
 0x1df   :  { %s367_s23 = smov 128   ;;  %s368_s24 = smov 8  }
 0x1e0   :  { %243 = dma.vmem_to_hbm [thread:$0]  %s238_s14, 128, %s443_s5, [#allocation5], %s367_s23, %s367_s23, %s368_s24  }
 0x1e1   :  { %359 = dma.done.wait [#allocation5], 256  }
 0x1e2   :  { %360 = vsyncadd [#allocation5], 4294967040 }
 0x1e3   :  { %247 = vsyncpa [#allocation4], 1 }
 0x1e4   :  { %248 = vsyncpa [#allocation5], 1 }

</bundles_post_ra>
